<compile_context>
chip_gen: v7x
topology: tpu7x:2x2x1
jax: 0.10.0
libtpu: 0.0.40
codegen_flags: <defaults>
</compile_context>

<pallas_src>
import functools

import jax
import jax.numpy as jnp
from jax.experimental import pallas as pl
from jax.experimental.pallas import tpu as pltpu

IN_FEATURES = 28 * 28
HIDDEN1, HIDDEN2, NUM_CLASSES = 128, 64, 10


def _round_up(n, m):
    return ((n + m - 1) // m) * m


def _cdiv(a, b):
    return (a + b - 1) // b


def _fcnet_kernel(x_ref, w1_ref, b1_ref, w2_ref, b2_ref, w3_ref, b3_ref, o_ref):
    # Per grid step:
    #   x : (tb, 784)  streamed        w1: (784,128)   b1: (1,128)
    #   w2: (128, 64)                  b2: (1, 64)
    #   w3: (64, 10)                   b3: (1, 10)
    #   o : (tb, 10)  softmax probabilities, f32
    # Matmul dtype == weight dtype (bf16 only where needed, e.g. v5e); the
    # astype() calls are no-ops when dtypes already match.  Accumulation f32;
    # bias add / ReLU / softmax stay f32 on the VPU/EUP.
    x = x_ref[...].astype(w1_ref.dtype)

    h1 = jnp.dot(x, w1_ref[...], preferred_element_type=jnp.float32)
    h1 = jnp.maximum(h1 + b1_ref[...], 0.0)

    h2 = jnp.dot(h1.astype(w2_ref.dtype), w2_ref[...],
                 preferred_element_type=jnp.float32)
    h2 = jnp.maximum(h2 + b2_ref[...], 0.0)

    logits = jnp.dot(h2.astype(w3_ref.dtype), w3_ref[...],
                     preferred_element_type=jnp.float32) + b3_ref[...]

    # Numerically stable softmax over the 10 classes (dim=1).  Exact divide:
    # denom is only (tb, 1) wide, so rows sum to 1 to f32 precision for free.
    m = jnp.max(logits, axis=-1, keepdims=True)
    e = jnp.exp(logits - m)
    denom = jnp.sum(e, axis=-1, keepdims=True)
    o_ref[...] = (e / denom).astype(o_ref.dtype)


def _default_mxu_dtype(x_dtype):
    """bf16 matmuls only where f32 would make the kernel compute-bound (v5)."""
    if jnp.dtype(x_dtype) == jnp.bfloat16:
        return "bfloat16"
    try:
        kind = jax.devices()[0].device_kind.lower()
    except Exception:
        kind = ""
    return "bfloat16" if "v5" in kind else "float32"


@functools.partial(jax.jit, static_argnames=("tile_b", "mxu"))
def _forward_impl(x, params, *, tile_b, mxu):
    mxu_dtype = jnp.dtype(mxu)
    B = x.shape[0]

    # nn.Flatten(): free reshape in the wrapper; keep the input's HBM dtype —
    # a standalone wrapper-side astype would add a full extra HBM read+write.
    x_flat = x.reshape(B, IN_FEATURES)
    x_itemsize = jnp.dtype(x_flat.dtype).itemsize
    row_align = 16 if x_itemsize == 2 else 8  # sublane packing for 16-bit streams

    # ---- batch tile ------------------------------------------------------
    # Large tiles amortize the ~0.35 us/step overhead; keep >=2 (ideally an
    # even number of) grid steps so the "parallel" axis shards across both
    # v7x TensorCores.  No padding: the last tile is ragged and its OOB rows
    # are discarded on writeback.
    tb = max(row_align,
             min(_round_up(tile_b, row_align), _round_up(_cdiv(B, 2), row_align)))
    n_steps = _cdiv(B, tb)
    if n_steps > 1 and n_steps % 2 == 1:
        tb = max(row_align, _round_up(_cdiv(B, n_steps + 1), row_align))
        n_steps = _cdiv(B, tb)

    # ---- weights: VMEM-resident via constant index maps (<0.5 MB) ---------
    w1 = params["w1"].astype(mxu_dtype)
    w2 = params["w2"].astype(mxu_dtype)
    w3 = params["w3"].astype(mxu_dtype)
    b1 = params["b1"].reshape(1, -1).astype(jnp.float32)
    b2 = params["b2"].reshape(1, -1).astype(jnp.float32)
    b3 = params["b3"].reshape(1, -1).astype(jnp.float32)

    def resident(a):
        return pl.BlockSpec(a.shape, lambda i: (0,) * a.ndim)

    w_bytes = sum(int(a.size) * jnp.dtype(a.dtype).itemsize
                  for a in (w1, b1, w2, b2, w3, b3))

    # VMEM budget: double-buffered activation stream + resident weights, with
    # headroom; clamped to [32 MiB, 64 MiB] so it lifts v5e's 16 MiB scoped
    # default without exceeding v7x's 64 MiB physical VMEM.
    in_buf = 2 * tb * IN_FEATURES * x_itemsize
    out_buf = 2 * tb * NUM_CLASSES * 4
    vmem_limit = int(min(64 * 2**20, max(32 * 2**20, 2 * (in_buf + out_buf + w_bytes))))

    cost = pl.CostEstimate(
        flops=2 * B * (IN_FEATURES * HIDDEN1 + HIDDEN1 * HIDDEN2 + HIDDEN2 * NUM_CLASSES),
        transcendentals=NUM_CLASSES * B,
        bytes_accessed=B * (IN_FEATURES * x_itemsize + NUM_CLASSES * 4) + w_bytes,
    )

    out = pl.pallas_call(
        _fcnet_kernel,
        out_shape=jax.ShapeDtypeStruct((B, NUM_CLASSES), jnp.float32),
        grid=(n_steps,),
        in_specs=[
            pl.BlockSpec((tb, IN_FEATURES), lambda i: (i, 0)),  # streamed activations
            resident(w1), resident(b1),
            resident(w2), resident(b2),
            resident(w3), resident(b3),
        ],
        out_specs=pl.BlockSpec((tb, NUM_CLASSES), lambda i: (i, 0)),
        compiler_params=pltpu.CompilerParams(
            dimension_semantics=("parallel",),   # megacore on v7x; harmless elsewhere
            vmem_limit_bytes=vmem_limit,
        ),
        cost_estimate=cost,
    )(x_flat, w1, b1, w2, b2, w3, b3)
    return out


def simple_fcnet_forward(x, params, *, tile_b=1024, mxu_dtype=None):
    """Eval-mode SimpleFCNet forward.  x: (B, 28, 28).  Returns (B, 10) softmax."""
    mxu = _default_mxu_dtype(x.dtype) if mxu_dtype is None else jnp.dtype(mxu_dtype).name
    return _forward_impl(x, params, tile_b=int(tile_b), mxu=mxu)


def _xavier_uniform(key, fan_in, fan_out):
    # Matches torch.nn.init.xavier_uniform_ (gain=1): U(-a, a), a = sqrt(6/(fan_in+fan_out))
    a = jnp.sqrt(6.0 / (fan_in + fan_out))
    return jax.random.uniform(key, (fan_in, fan_out), jnp.float32, minval=-a, maxval=a)


def init_params(key):
    k1, k2, k3 = jax.random.split(key, 3)
    return {
        "w1": _xavier_uniform(k1, IN_FEATURES, HIDDEN1),
        "b1": jnp.zeros((1, HIDDEN1), jnp.float32),
        "w2": _xavier_uniform(k2, HIDDEN1, HIDDEN2),
        "b2": jnp.zeros((1, HIDDEN2), jnp.float32),
        "w3": _xavier_uniform(k3, HIDDEN2, NUM_CLASSES),
        "b3": jnp.zeros((1, NUM_CLASSES), jnp.float32),
    }


def _reference_forward(x, params):
    """Pure-JAX f32 reference (eval-mode PyTorch forward)."""
    B = x.shape[0]
    h = x.reshape(B, IN_FEATURES).astype(jnp.float32)
    h = jnp.maximum(h @ params["w1"] + params["b1"], 0.0)
    h = jnp.maximum(h @ params["w2"] + params["b2"], 0.0)
    logits = h @ params["w3"] + params["b3"]
    return jax.nn.softmax(logits, axis=-1)


if __name__ == "__main__":
    key = jax.random.PRNGKey(0)
    pkey, xkey = jax.random.split(key)
    params = init_params(pkey)

    # Small MNIST-shaped batch.
    x = jax.random.normal(xkey, (8, 28, 28), jnp.float32)
    out = jax.block_until_ready(simple_fcnet_forward(x, params))
    ref = _reference_forward(x, params)
    assert out.shape == (8, 10)
    # exact softmax divide -> rows sum to 1 to f32 precision
    assert bool(jnp.allclose(jnp.sum(out, axis=1), 1.0, atol=1e-3))
    # f32 MXU path matches tightly; bf16 path (v5) needs the looser bound
    assert bool(jnp.allclose(out, ref, atol=3e-2))

    # Ragged batch (B not a multiple of the tile): exercises the pad-free grid.
    x2 = jax.random.normal(jax.random.PRNGKey(1), (13, 28, 28), jnp.float32)
    out2 = jax.block_until_ready(simple_fcnet_forward(x2, params))
    ref2 = _reference_forward(x2, params)
    assert out2.shape == (13, 10)
    assert bool(jnp.allclose(out2, ref2, atol=3e-2))

    print("KERNEL_OK")
</pallas_src>

<mosaic_0001>
module attributes {stable_mosaic.version = 11 : i64} {
  func.func @_fcnet_kernel(%arg0: i32, %arg1: memref<8x784xf32, #tpu.memory_space<vmem>>, %arg2: memref<784x128xf32, #tpu.memory_space<vmem>>, %arg3: memref<1x128xf32, #tpu.memory_space<vmem>>, %arg4: memref<128x64xf32, #tpu.memory_space<vmem>>, %arg5: memref<1x64xf32, #tpu.memory_space<vmem>>, %arg6: memref<64x10xf32, #tpu.memory_space<vmem>>, %arg7: memref<1x10xf32, #tpu.memory_space<vmem>>, %arg8: memref<8x10xf32, #tpu.memory_space<vmem>>) attributes {dimension_semantics = [#tpu.dimension_semantics<parallel>], iteration_bounds = array<i64: 1>, scalar_prefetch = 0 : i64, scratch_operands = 0 : i64, tpu.core_type = #tpu.core_type<tc>, window_params = [{transform_indices = @transform_0, window_bounds = array<i64: 8, 784>}, {pipeline_mode = #tpu.pipeline_mode<synchronous>, transform_indices = @transform_1, window_bounds = array<i64: 784, 128>}, {pipeline_mode = #tpu.pipeline_mode<synchronous>, transform_indices = @transform_2, window_bounds = array<i64: 1, 128>}, {pipeline_mode = #tpu.pipeline_mode<synchronous>, transform_indices = @transform_3, window_bounds = array<i64: 128, 64>}, {pipeline_mode = #tpu.pipeline_mode<synchronous>, transform_indices = @transform_4, window_bounds = array<i64: 1, 64>}, {pipeline_mode = #tpu.pipeline_mode<synchronous>, transform_indices = @transform_5, window_bounds = array<i64: 64, 10>}, {pipeline_mode = #tpu.pipeline_mode<synchronous>, transform_indices = @transform_6, window_bounds = array<i64: 1, 10>}, {transform_indices = @transform_7, window_bounds = array<i64: 8, 10>}]} {
    %c0 = arith.constant 0 : index
    %c0_0 = arith.constant 0 : index
    %0 = vector.load %arg1[%c0, %c0_0] : memref<8x784xf32, #tpu.memory_space<vmem>>, vector<8x784xf32>
    %c0_1 = arith.constant 0 : index
    %c0_2 = arith.constant 0 : index
    %1 = vector.load %arg2[%c0_1, %c0_2] : memref<784x128xf32, #tpu.memory_space<vmem>>, vector<784x128xf32>
    %cst = arith.constant dense<0.000000e+00> : vector<8x128xf32>
    %2 = tpu.matmul %0, %1, %cst {dimension_numbers = #tpu.dot_dimension_numbers<[1], [0], [0], [1], [0, 0, 1, 1], [], []>} : vector<8x784xf32>, vector<784x128xf32>, vector<8x128xf32> -> vector<8x128xf32>
    %c0_3 = arith.constant 0 : index
    %c0_4 = arith.constant 0 : index
    %3 = vector.load %arg3[%c0_3, %c0_4] : memref<1x128xf32, #tpu.memory_space<vmem>>, vector<1x128xf32>
    %4 = vector.broadcast %3 : vector<1x128xf32> to vector<8x128xf32>
    %5 = arith.addf %2, %4 : vector<8x128xf32>
    %cst_5 = arith.constant 0.000000e+00 : f32
    %6 = vector.broadcast %cst_5 : f32 to vector<8x128xf32>
    %7 = arith.maximumf %5, %6 : vector<8x128xf32>
    %c0_6 = arith.constant 0 : index
    %c0_7 = arith.constant 0 : index
    %8 = vector.load %arg4[%c0_6, %c0_7] : memref<128x64xf32, #tpu.memory_space<vmem>>, vector<128x64xf32>
    %cst_8 = arith.constant dense<0.000000e+00> : vector<8x64xf32>
    %9 = tpu.matmul %7, %8, %cst_8 {dimension_numbers = #tpu.dot_dimension_numbers<[1], [0], [0], [1], [0, 0, 1, 1], [], []>} : vector<8x128xf32>, vector<128x64xf32>, vector<8x64xf32> -> vector<8x64xf32>
    %c0_9 = arith.constant 0 : index
    %c0_10 = arith.constant 0 : index
    %10 = vector.load %arg5[%c0_9, %c0_10] : memref<1x64xf32, #tpu.memory_space<vmem>>, vector<1x64xf32>
    %11 = vector.broadcast %10 : vector<1x64xf32> to vector<8x64xf32>
    %12 = arith.addf %9, %11 : vector<8x64xf32>
    %cst_11 = arith.constant 0.000000e+00 : f32
    %13 = vector.broadcast %cst_11 : f32 to vector<8x64xf32>
    %14 = arith.maximumf %12, %13 : vector<8x64xf32>
    %c0_12 = arith.constant 0 : index
    %c0_13 = arith.constant 0 : index
    %15 = vector.load %arg6[%c0_12, %c0_13] : memref<64x10xf32, #tpu.memory_space<vmem>>, vector<64x10xf32>
    %cst_14 = arith.constant dense<0.000000e+00> : vector<8x10xf32>
    %16 = tpu.matmul %14, %15, %cst_14 {dimension_numbers = #tpu.dot_dimension_numbers<[1], [0], [0], [1], [0, 0, 1, 1], [], []>} : vector<8x64xf32>, vector<64x10xf32>, vector<8x10xf32> -> vector<8x10xf32>
    %c0_15 = arith.constant 0 : index
    %c0_16 = arith.constant 0 : index
    %17 = vector.load %arg7[%c0_15, %c0_16] : memref<1x10xf32, #tpu.memory_space<vmem>>, vector<1x10xf32>
    %18 = vector.broadcast %17 : vector<1x10xf32> to vector<8x10xf32>
    %19 = arith.addf %16, %18 : vector<8x10xf32>
    %cst_17 = arith.constant dense<0xFF800000> : vector<8xf32>
    %20 = vector.multi_reduction <maximumf>, %19, %cst_17 [1] : vector<8x10xf32> to vector<8xf32>
    %21 = vector.shape_cast %20 : vector<8xf32> to vector<8x1xf32>
    %22 = vector.broadcast %21 : vector<8x1xf32> to vector<8x10xf32>
    %23 = arith.subf %19, %22 : vector<8x10xf32>
    %24 = math.exp %23 : vector<8x10xf32>
    %cst_18 = arith.constant dense<0.000000e+00> : vector<8xf32>
    %25 = vector.multi_reduction <add>, %24, %cst_18 [1] : vector<8x10xf32> to vector<8xf32>
    %26 = vector.shape_cast %25 : vector<8xf32> to vector<8x1xf32>
    %27 = vector.broadcast %26 : vector<8x1xf32> to vector<8x10xf32>
    %28 = arith.divf %24, %27 : vector<8x10xf32>
    %c0_19 = arith.constant 0 : index
    %c0_20 = arith.constant 0 : index
    %29 = vector.load %arg8[%c0_19, %c0_20] : memref<8x10xf32, #tpu.memory_space<vmem>>, vector<8x10xf32>
    tpu.vector_store %arg8[%c0_19, %c0_20], %28 {strides = array<i32>} : memref<8x10xf32, #tpu.memory_space<vmem>>, vector<8x10xf32>,
    return
  }
  func.func @transform_0(%arg0: i32) -> (i32, i32) {
    %c0_i32 = arith.constant 0 : i32
    %c0_i32_0 = arith.constant 0 : i32
    return %arg0, %c0_i32 : i32, i32
  }
  func.func @transform_1(%arg0: i32) -> (i32, i32) {
    %c0_i32 = arith.constant 0 : i32
    %c0_i32_0 = arith.constant 0 : i32
    %c0_i32_1 = arith.constant 0 : i32
    return %c0_i32, %c0_i32_0 : i32, i32
  }
  func.func @transform_2(%arg0: i32) -> (i32, i32) {
    %c0_i32 = arith.constant 0 : i32
    %c0_i32_0 = arith.constant 0 : i32
    %c0_i32_1 = arith.constant 0 : i32
    return %c0_i32, %c0_i32_0 : i32, i32
  }
  func.func @transform_3(%arg0: i32) -> (i32, i32) {
    %c0_i32 = arith.constant 0 : i32
    %c0_i32_0 = arith.constant 0 : i32
    %c0_i32_1 = arith.constant 0 : i32
    return %c0_i32, %c0_i32_0 : i32, i32
  }
  func.func @transform_4(%arg0: i32) -> (i32, i32) {
    %c0_i32 = arith.constant 0 : i32
    %c0_i32_0 = arith.constant 0 : i32
    %c0_i32_1 = arith.constant 0 : i32
    return %c0_i32, %c0_i32_0 : i32, i32
  }
  func.func @transform_5(%arg0: i32) -> (i32, i32) {
    %c0_i32 = arith.constant 0 : i32
    %c0_i32_0 = arith.constant 0 : i32
    %c0_i32_1 = arith.constant 0 : i32
    return %c0_i32, %c0_i32_0 : i32, i32
  }
  func.func @transform_6(%arg0: i32) -> (i32, i32) {
    %c0_i32 = arith.constant 0 : i32
    %c0_i32_0 = arith.constant 0 : i32
    %c0_i32_1 = arith.constant 0 : i32
    return %c0_i32, %c0_i32_0 : i32, i32
  }
  func.func @transform_7(%arg0: i32) -> (i32, i32) {
    %c0_i32 = arith.constant 0 : i32
    %c0_i32_0 = arith.constant 0 : i32
    return %arg0, %c0_i32 : i32, i32
  }
}

</mosaic_0001>

<bundles_post_ra>
// kernel: _forward_impl.1
= control target key start
LH: loop header
LB: loop body
LE: loop exit
PB: predicated region body
PF: predicated region fallthrough
CT: control target
= control target key end

     0   :  { %s1472_s0 = inlined_call_operand.vmem [shape: f32[8,784], index: 0, kind: input, shape index: {}]   ;;  %s1473_s1 = inlined_call_operand.vmem [shape: f32[784,128], index: 1, kind: input, shape index: {}]   ;;  %s1474_s2 = inlined_call_operand.vmem [shape: f32[1,128], index: 2, kind: input, shape index: {}]   ;;  %s1475_s3 = inlined_call_operand.vmem [shape: f32[128,64], index: 3, kind: input, shape index: {}]   ;;  %s1476_s4 = inlined_call_operand.vmem [shape: f32[1,64], index: 4, kind: input, shape index: {}]   ;;  %s1477_s5 = inlined_call_operand.vmem [shape: f32[64,10], index: 5, kind: input, shape index: {}]   ;;  %s1478_s6 = inlined_call_operand.vmem [shape: f32[1,10], index: 6, kind: input, shape index: {}]   ;;  %s1479_s7 = inlined_call_operand.hbm [shape: f32[8,10], index: 7, kind: output, shape index: {}]  }
   0x1   :  { %v50_v0 = vld [vmem:[%s1473_s1 + $0x80] sm:$0xff]  ;;  %v51_v1 = vld [vmem:[%s1473_s1 + $0x88] sm:$0xff]  ;;  %v52_v11 = vld [vmem:[%s1473_s1 + $0x90] sm:$0xff] }
   0x2   :  { %v34_v2 = vld [vmem:[%s1473_s1] sm:$0xff]  ;;  %v834_v3 = vpack.c.bf16 %v51_v1, %v50_v0  ;;  %v35_v4 = vld [vmem:[%s1473_s1 + $0x8] sm:$0xff]  ;;  %v53_v13 = vld [vmem:[%s1473_s1 + $0x98] sm:$0xff] }
   0x3   :  { %v82_v5 = vld [vmem:[%s1473_s1 + $0x180] sm:$0xff]  ;;  %v83_v6 = vld [vmem:[%s1473_s1 + $0x188] sm:$0xff]  ;;  %v836_v7 = vpack.c.bf16 %v35_v4, %v34_v2  ;;  %v36_v14 = vld [vmem:[%s1473_s1 + $0x10] sm:$0xff]  ;;  %v838_v16 = vpack.c.bf16 %v53_v13, %v52_v11 }
   0x4   :  { %v866_v8 = vpack.c.bf16 %v83_v6, %v82_v5  ;;  %v66_v9 = vld [vmem:[%s1473_s1 + $0x100] sm:$0xff]  ;;  %v67_v10 = vld [vmem:[%s1473_s1 + $0x108] sm:$0xff]  ;;  %835 = vmatprep.subr.bf16.mxu0 %v834_v3  ;;  %v37_v15 = vld [vmem:[%s1473_s1 + $0x18] sm:$0xff] }
   0x5   :  { %v868_v12 = vpack.c.bf16 %v67_v10, %v66_v9  ;;  %837 = vmatpush3.bf16.msra.mxu0 %v836_v7  ;;  %v840_v17 = vpack.c.bf16 %v37_v15, %v36_v14  ;;  %v84_v18 = vld [vmem:[%s1473_s1 + $0x190] sm:$0xff]  ;;  %v85_v19 = vld [vmem:[%s1473_s1 + $0x198] sm:$0xff]  ;;  %v54_v23 = vld [vmem:[%s1473_s1 + $0xa0] sm:$0xff] }
   0x6   :  { %867 = vmatprep.subr.bf16.mxu1 %v866_v8  ;;  %v68_v20 = vld [vmem:[%s1473_s1 + $0x110] sm:$0xff]  ;;  %v870_v21 = vpack.c.bf16 %v85_v19, %v84_v18  ;;  %v69_v22 = vld [vmem:[%s1473_s1 + $0x118] sm:$0xff]  ;;  %v55_v24 = vld [vmem:[%s1473_s1 + $0xa8] sm:$0xff]  ;;  %839 = vmatprep.subr.bf16.mxu0 %v838_v16 }
   0x7   :  { %869 = vmatpush3.bf16.msra.mxu1 %v868_v12  ;;  %v872_v25 = vpack.c.bf16 %v69_v22, %v68_v20  ;;  %v842_v26 = vpack.c.bf16 %v55_v24, %v54_v23  ;;  %v38_v27 = vld [vmem:[%s1473_s1 + $0x20] sm:$0xff]  ;;  %v39_v28 = vld [vmem:[%s1473_s1 + $0x28] sm:$0xff]  ;;  %v56_v35 = vld [vmem:[%s1473_s1 + $0xb0] sm:$0xff] }
   0x8   :  { %v86_v29 = vld [vmem:[%s1473_s1 + $0x1a0] sm:$0xff]  ;;  %871 = vmatprep.subr.bf16.mxu1 %v870_v21  ;;  %v87_v30 = vld [vmem:[%s1473_s1 + $0x1a8] sm:$0xff]  ;;  %v844_v33 = vpack.c.bf16 %v39_v28, %v38_v27  ;;  %v57_v36 = vld [vmem:[%s1473_s1 + $0xb8] sm:$0xff] }
   0x9   :  { %v70_v31 = vld [vmem:[%s1473_s1 + $0x120] sm:$0xff]  ;;  %v71_v32 = vld [vmem:[%s1473_s1 + $0x128] sm:$0xff]  ;;  %841 = vmatpush3.bf16.msra.mxu0 %v840_v17  ;;  %v874_v34 = vpack.c.bf16 %v87_v30, %v86_v29  ;;  %v40_v37 = vld [vmem:[%s1473_s1 + $0x30] sm:$0xff]  ;;  %v846_v39 = vpack.c.bf16 %v57_v36, %v56_v35 }
   0xa   :  { %843 = vmatprep.subr.bf16.mxu0 %v842_v26  ;;  %v876_v38 = vpack.c.bf16 %v71_v32, %v70_v31  ;;  %v41_v40 = vld [vmem:[%s1473_s1 + $0x38] sm:$0xff]  ;;  %v88_v41 = vld [vmem:[%s1473_s1 + $0x1b0] sm:$0xff]  ;;  %v58_v46 = vld [vmem:[%s1473_s1 + $0xc0] sm:$0xff] }
   0xb   :  { %873 = vmatpush3.bf16.msra.mxu1 %v872_v25  ;;  %v89_v42 = vld [vmem:[%s1473_s1 + $0x1b8] sm:$0xff]  ;;  %v72_v44 = vld [vmem:[%s1473_s1 + $0x130] sm:$0xff]  ;;  %v59_v47 = vld [vmem:[%s1473_s1 + $0xc8] sm:$0xff]  ;;  %v848_v48 = vpack.c.bf16 %v41_v40, %v40_v37 }
   0xc   :  { %875 = vmatprep.subr.bf16.mxu1 %v874_v34  ;;  %v878_v43 = vpack.c.bf16 %v89_v42, %v88_v41  ;;  %v73_v45 = vld [vmem:[%s1473_s1 + $0x138] sm:$0xff]  ;;  %v90_v49 = vld [vmem:[%s1473_s1 + $0x1c0] sm:$0xff]  ;;  %v91_v50 = vld [vmem:[%s1473_s1 + $0x1c8] sm:$0xff]  ;;  %v850_v52 = vpack.c.bf16 %v59_v47, %v58_v46 }
   0xd   :  { %845 = vmatpush3.bf16.msra.mxu0 %v844_v33  ;;  %v880_v51 = vpack.c.bf16 %v73_v45, %v72_v44  ;;  %v42_v53 = vld [vmem:[%s1473_s1 + $0x40] sm:$0xff]  ;;  %v43_v54 = vld [vmem:[%s1473_s1 + $0x48] sm:$0xff]  ;;  %v882_v56 = vpack.c.bf16 %v91_v50, %v90_v49  ;;  %v60_v58 = vld [vmem:[%s1473_s1 + $0xd0] sm:$0xff]  ;;  %v1001_v50 = vmov 0.0|0.0  }
   0xe   :  { %847 = vmatprep.subr.bf16.mxu0 %v846_v39  ;;  %v74_v55 = vld [vmem:[%s1473_s1 + $0x140] sm:$0xff]  ;;  %v75_v57 = vld [vmem:[%s1473_s1 + $0x148] sm:$0xff]  ;;  %v61_v59 = vld [vmem:[%s1473_s1 + $0xd8] sm:$0xff]  ;;  %v852_v62 = vpack.c.bf16 %v43_v54, %v42_v53 }
   0xf   :  { %877 = vmatpush3.bf16.msra.mxu1 %v876_v38  ;;  %v92_v60 = vld [vmem:[%s1473_s1 + $0x1d0] sm:$0xff]  ;;  %v93_v61 = vld [vmem:[%s1473_s1 + $0x1d8] sm:$0xff]  ;;  %v884_v63 = vpack.c.bf16 %v75_v57, %v74_v55  ;;  %v854_v0 = vpack.c.bf16 %v61_v59, %v60_v58  ;;  %v62_v6 = vld [vmem:[%s1473_s1 + $0xe0] sm:$0xff] }
  0x10   :  { %879 = vmatprep.subr.bf16.mxu1 %v878_v43  ;;  %v44_v1 = vld [vmem:[%s1473_s1 + $0x50] sm:$0xff]  ;;  %v45_v2 = vld [vmem:[%s1473_s1 + $0x58] sm:$0xff]  ;;  %v886_v4 = vpack.c.bf16 %v93_v61, %v92_v60  ;;  %v63_v7 = vld [vmem:[%s1473_s1 + $0xe8] sm:$0xff] }
  0x11   :  { %849 = vmatpush3.bf16.msra.mxu0 %v848_v48  ;;  %v76_v3 = vld [vmem:[%s1473_s1 + $0x150] sm:$0xff]  ;;  %v77_v5 = vld [vmem:[%s1473_s1 + $0x158] sm:$0xff]  ;;  %v94_v8 = vld [vmem:[%s1473_s1 + $0x1e0] sm:$0xff]  ;;  %v856_v10 = vpack.c.bf16 %v45_v2, %v44_v1  ;;  %v858_v14 = vpack.c.bf16 %v63_v7, %v62_v6 }
  0x12   :  { %851 = vmatprep.subr.bf16.mxu0 %v850_v52  ;;  %v95_v9 = vld [vmem:[%s1473_s1 + $0x1e8] sm:$0xff]  ;;  %v46_v11 = vld [vmem:[%s1473_s1 + $0x60] sm:$0xff]  ;;  %v888_v13 = vpack.c.bf16 %v77_v5, %v76_v3  ;;  %v64_v19 = vld [vmem:[%s1473_s1 + $0xf0] sm:$0xff] }
  0x13   :  { %881 = vmatpush3.bf16.msra.mxu1 %v880_v51  ;;  %v28_v12 = vld [vmem:[%s1472_s0 + $0x8] sm:$0xff]  ;;  %v78_v16 = vld [vmem:[%s1473_s1 + $0x160] sm:$0xff]  ;;  %v890_v18 = vpack.c.bf16 %v95_v9, %v94_v8  ;;  %v65_v20 = vld [vmem:[%s1473_s1 + $0xf8] sm:$0xff] }
  0x14   :  { %883 = vmatprep.subr.bf16.mxu1 %v882_v56  ;;  %v47_v15 = vld [vmem:[%s1473_s1 + $0x68] sm:$0xff]  ;;  %207 = vmatprep.mubr.f32.mxu0 %v28_v12  ;;  %v30_v21 = vld [vmem:[%s1472_s0 + $0x18] sm:$0xff]  ;;  %v96_v22 = vld [vmem:[%s1473_s1 + $0x1f0] sm:$0xff]  ;;  %v862_v26 = vpack.c.bf16 %v65_v20, %v64_v19 }
  0x15   :  { %853 = vmatpush3.bf16.msra.mxu0 %v852_v62  ;;  %v79_v17 = vld [vmem:[%s1473_s1 + $0x168] sm:$0xff]  ;;  %v97_v23 = vld [vmem:[%s1473_s1 + $0x1f8] sm:$0xff]  ;;  %277 = vmatprep.mubr.f32.mxu1 %v30_v21  ;;  %v860_v24 = vpack.c.bf16 %v47_v15, %v46_v11  ;;  %v48_v27 = vld [vmem:[%s1473_s1 + $0x70] sm:$0xff] }
  0x16   :  { %855 = vmatprep.subr.bf16.mxu0 %v854_v0  ;;  %v892_v25 = vpack.c.bf16 %v79_v17, %v78_v16  ;;  %v49_v28 = vld [vmem:[%s1473_s1 + $0x78] sm:$0xff]  ;;  %v80_v29 = vld [vmem:[%s1473_s1 + $0x170] sm:$0xff]  ;;  %v894_v30 = vpack.c.bf16 %v97_v23, %v96_v22  ;;  %v114_v32 = vld [vmem:[%s1473_s1 + $0x280] sm:$0xff] }
  0x17   :  { %885 = vmatpush3.bf16.msra.mxu1 %v884_v63  ;;  %v81_v31 = vld [vmem:[%s1473_s1 + $0x178] sm:$0xff]  ;;  %v115_v33 = vld [vmem:[%s1473_s1 + $0x288] sm:$0xff]  ;;  %v864_v34 = vpack.c.bf16 %v49_v28, %v48_v27  ;;  %v98_v37 = vld [vmem:[%s1473_s1 + $0x200] sm:$0xff] }
  0x18   :  { %887 = vmatprep.subr.bf16.mxu1 %v886_v4  ;;  %v896_v35 = vpack.c.bf16 %v81_v31, %v80_v29  ;;  %v898_v36 = vpack.c.bf16 %v115_v33, %v114_v32  ;;  %v99_v38 = vld [vmem:[%s1473_s1 + $0x208] sm:$0xff]  ;;  %v116_v39 = vld [vmem:[%s1473_s1 + $0x290] sm:$0xff]  ;;  %v117_v40 = vld [vmem:[%s1473_s1 + $0x298] sm:$0xff] }
  0x19   :  { %857 = vmatpush3.bf16.msra.mxu0 %v856_v10  ;;  %v27_v41 = vld [vmem:[%s1472_s0] sm:$0xff]  ;;  %v900_v42 = vpack.c.bf16 %v99_v38, %v98_v37  ;;  %v29_v43 = vld [vmem:[%s1472_s0 + $0x10] sm:$0xff]  ;;  %v902_v45 = vpack.c.bf16 %v117_v40, %v116_v39  ;;  %v101_v46 = vld [vmem:[%s1473_s1 + $0x218] sm:$0xff] }
  0x1a   :  { %859 = vmatprep.subr.bf16.mxu0 %v858_v14  ;;  %v100_v44 = vld [vmem:[%s1473_s1 + $0x210] sm:$0xff]  ;;  %v118_v47 = vld [vmem:[%s1473_s1 + $0x2a0] sm:$0xff]  ;;  %v119_v48 = vld [vmem:[%s1473_s1 + $0x2a8] sm:$0xff] }
  0x1b   :  { %889 = vmatpush3.bf16.msra.mxu1 %v888_v13  ;;  %v32_v49 = vld [vmem:[%s1472_s0 + $0x28] sm:$0xff]  ;;  %v130_v51 = vld [vmem:[%s1473_s1 + $0x300] sm:$0xff] }
  0x1c   :  { %891 = vmatprep.subr.bf16.mxu1 %v890_v18  ;;  %v131_v52 = vld [vmem:[%s1473_s1 + $0x308] sm:$0xff] }
  0x1d   :  { %861 = vmatpush3.bf16.msra.mxu0 %v860_v24  ;;  %v931_v53 = vpack.c.bf16 %v131_v52, %v130_v51 }
  0x1e   :  { %863 = vmatprep.subr.bf16.mxu0 %v862_v26 }
  0x1f   :  { %893 = vmatpush3.bf16.msra.mxu1 %v892_v25 }
  0x20   :  { %895 = vmatprep.subr.bf16.mxu1 %v894_v30 }
  0x21   :  { %865 = vmatpush3.bf16.msra.mxu0 %v864_v34 }
  0x22   :  { %899 = vmatprep.subr.bf16.mxu0 %v898_v36 }
  0x23   :  { %897 = vmatpush3.bf16.msra.mxu1 %v896_v35 }
  0x24   :  { %930 = vmatprep.subr.bf16.mxu1 %v1001_v50  ;;  %208 = vmatmul.mubr.f32.vlgmr.msra.gmra.mrb[0].mxu0 %v27_v41 }
  0x25   :  { %12 = vsyncpa [#allocation3], 0  ;;  %901 = vmatpush3.bf16.msra.mxu0 %v900_v42  ;;  %v904_v54 = vpack.c.bf16 %v101_v46, %v100_v44  ;;  %v906_v55 = vpack.c.bf16 %v119_v48, %v118_v47  ;;  %v102_v56 = vld [vmem:[%s1473_s1 + $0x220] sm:$0xff]  ;;  %v103_v57 = vld [vmem:[%s1473_s1 + $0x228] sm:$0xff]  ;;  %347 = vmatprep.mubr.f32.mxu0 %v32_v49  ;;  %vm1002_vm0 = vmmov 0   ;;  %v1003_v60 = vmov 0.0  }
  0x26   :  { %278 = vmatmul.mubr.f32.vlgmr.msra.gmra.mrb[0].mxu1 %v29_v43  ;;  %903 = vmatprep.subr.bf16.mxu0 %v902_v45  ;;  %v120_v58 = vld [vmem:[%s1473_s1 + $0x2b0] sm:$0xff]  ;;  %v121_v59 = vld [vmem:[%s1473_s1 + $0x2b8] sm:$0xff]  ;;  %vm139_vm1 = vcmask 130048   ;;  %v908_v62 = vpack.c.bf16 %v103_v57, %v102_v56  ;;  %v122_v2 = vld [vmem:[%s1473_s1 + $0x2c0] sm:$0xff]  ;;  %vm533_vm2 = vcmask 523264   ;;  %vm607_vm3 = vcmask 80896  }
  0x27   :  { %932 = vmatpush3.bf16.msra.mxu1 %v931_v53  ;;  %777 = vmatprep.mubr.msk.f32.mxu1 %vm1002_vm0, %v1003_v60  ;;  %v33_v61 = vld [vmem:[%s1472_s0 + $0x30] sm:$0xff]  ;;  %v910_v63 = vpack.c.bf16 %v121_v59, %v120_v58  ;;  %v105_v1 = vld [vmem:[%s1473_s1 + $0x238] sm:$0xff]  ;;  %v123_v3 = vld [vmem:[%s1473_s1 + $0x2c8] sm:$0xff] }
  0x28   :  { %933 = vmatprep.subr.bf16.mxu1 %v1001_v50  ;;  %v104_v0 = vld [vmem:[%s1473_s1 + $0x230] sm:$0xff]  ;;  %v914_v5 = vpack.c.bf16 %v123_v3, %v122_v2  ;;  %v106_v6 = vld [vmem:[%s1473_s1 + $0x240] sm:$0xff]  ;;  %v107_v7 = vld [vmem:[%s1473_s1 + $0x248] sm:$0xff] }
  0x29   :  { %905 = vmatpush3.bf16.msra.mxu0 %v904_v54  ;;  %v912_v4 = vpack.c.bf16 %v105_v1, %v104_v0  ;;  %v124_v8 = vld [vmem:[%s1473_s1 + $0x2d0] sm:$0xff]  ;;  %v125_v9 = vld [vmem:[%s1473_s1 + $0x2d8] sm:$0xff]  ;;  %v916_v10 = vpack.c.bf16 %v107_v7, %v106_v6  ;;  %v126_v14 = vld [vmem:[%s1473_s1 + $0x2e0] sm:$0xff] }
  0x2a   :  { %907 = vmatprep.subr.bf16.mxu0 %v906_v55  ;;  %778 = vmatmul.mubr.msk.f32.vlgmr.msra.gmra.mrb[2].mxu1 %vm139_vm1, %v33_v61  ;;  %v918_v11 = vpack.c.bf16 %v125_v9, %v124_v8  ;;  %v108_v12 = vld [vmem:[%s1473_s1 + $0x250] sm:$0xff]  ;;  %v109_v13 = vld [vmem:[%s1473_s1 + $0x258] sm:$0xff]  ;;  %v127_v15 = vld [vmem:[%s1473_s1 + $0x2e8] sm:$0xff] }
  0x2b   :  { %812 = vmatprep.mubr.msk.f32.mxu1 %vm1002_vm0, %v1003_v60  ;;  %v920_v16 = vpack.c.bf16 %v109_v13, %v108_v12  ;;  %v922_v17 = vpack.c.bf16 %v127_v15, %v126_v14  ;;  %v110_v18 = vld [vmem:[%s1473_s1 + $0x260] sm:$0xff]  ;;  %v111_v19 = vld [vmem:[%s1473_s1 + $0x268] sm:$0xff]  ;;  %v128_v20 = vld [vmem:[%s1473_s1 + $0x2f0] sm:$0xff] }
  0x2c   :  { %v129_v21 = vld [vmem:[%s1473_s1 + $0x2f8] sm:$0xff]  ;;  %v924_v22 = vpack.c.bf16 %v111_v19, %v110_v18  ;;  %v112_v24 = vld [vmem:[%s1473_s1 + $0x270] sm:$0xff]  ;;  %v31_v27 = vld [vmem:[%s1472_s0 + $0x20] sm:$0xff] }
  0x2d   :  { %909 = vmatpush3.bf16.msra.mxu0 %v908_v62  ;;  %v926_v23 = vpack.c.bf16 %v129_v21, %v128_v20  ;;  %v113_v25 = vld [vmem:[%s1473_s1 + $0x278] sm:$0xff]  ;;  %v424_v28 = vld [vmem:[%s1475_s3] sm:$0xff]  ;;  %v425_v29 = vld [vmem:[%s1475_s3 + $0x8] sm:$0xff] }
  0x2e   :  { %911 = vmatprep.subr.bf16.mxu0 %v910_v63  ;;  %v928_v26 = vpack.c.bf16 %v113_v25, %v112_v24  ;;  %v426_v30 = vld [vmem:[%s1475_s3 + $0x10] sm:$0xff]  ;;  %v934_v31 = vpack.c.bf16 %v425_v29, %v424_v28  ;;  %v427_v32 = vld [vmem:[%s1475_s3 + $0x18] sm:$0xff]  ;;  %v428_v34 = vld [vmem:[%s1475_s3 + $0x20] sm:$0xff] }
  0x2f   :  { %v937_v33 = vpack.c.bf16 %v427_v32, %v426_v30  ;;  %v429_v35 = vld [vmem:[%s1475_s3 + $0x28] sm:$0xff]  ;;  %v430_v37 = vld [vmem:[%s1475_s3 + $0x30] sm:$0xff]  ;;  %v431_v38 = vld [vmem:[%s1475_s3 + $0x38] sm:$0xff] }
  0x30   :  { %935 = vmatpush3.bf16.msra.mxu1 %v934_v31  ;;  %v940_v36 = vpack.c.bf16 %v429_v35, %v428_v34  ;;  %v943_v39 = vpack.c.bf16 %v431_v38, %v430_v37  ;;  %v432_v40 = vld [vmem:[%s1475_s3 + $0x40] sm:$0xff]  ;;  %v433_v41 = vld [vmem:[%s1475_s3 + $0x48] sm:$0xff]  ;;  %v434_v43 = vld [vmem:[%s1475_s3 + $0x50] sm:$0xff] }
  0x31   :  { %913 = vmatpush3.bf16.msra.mxu0 %v912_v4  ;;  %936 = vmatprep.subr.bf16.mxu1 %v1001_v50  ;;  %v946_v42 = vpack.c.bf16 %v433_v41, %v432_v40  ;;  %v435_v44 = vld [vmem:[%s1475_s3 + $0x58] sm:$0xff]  ;;  %v436_v46 = vld [vmem:[%s1475_s3 + $0x60] sm:$0xff]  ;;  %v437_v47 = vld [vmem:[%s1475_s3 + $0x68] sm:$0xff] }
  0x32   :  { %915 = vmatprep.subr.bf16.mxu0 %v914_v5  ;;  %v949_v45 = vpack.c.bf16 %v435_v44, %v434_v43  ;;  %v952_v48 = vpack.c.bf16 %v437_v47, %v436_v46  ;;  %v438_v49 = vld [vmem:[%s1475_s3 + $0x70] sm:$0xff]  ;;  %v439_v51 = vld [vmem:[%s1475_s3 + $0x78] sm:$0xff]  ;;  %v518_v53 = vld [vmem:[%s1477_s5] sm:$0xff] }
  0x33   :  { %v955_v52 = vpack.c.bf16 %v439_v51, %v438_v49  ;;  %v519_v54 = vld [vmem:[%s1477_s5 + $0x8] sm:$0xff]  ;;  %v520_v55 = vld [vmem:[%s1477_s5 + $0x10] sm:$0xff]  ;;  %v521_v57 = vld [vmem:[%s1477_s5 + $0x18] sm:$0xff] }
  0x34   :  { %938 = vmatpush3.bf16.msra.mxu1 %v937_v33  ;;  %v958_v56 = vpack.c.bf16 %v519_v54, %v518_v53  ;;  %v961_v58 = vpack.c.bf16 %v521_v57, %v520_v55  ;;  %v522_v59 = vld [vmem:[%s1477_s5 + $0x20] sm:$0xff]  ;;  %v524_v14 = vld [vmem:[%s1477_s5 + $0x30] sm:$0xff]  ;;  %v525_v15 = vld [vmem:[%s1477_s5 + $0x38] sm:$0xff] }
  0x35   :  { %917 = vmatpush3.bf16.msra.mxu0 %v916_v10  ;;  %939 = vmatprep.subr.bf16.mxu1 %v1001_v50  ;;  %v634_v63 = vld [vmem:[%s1474_s2] ss:$0 sm:$0xff] }
  0x36   :  { %919 = vmatprep.subr.bf16.mxu0 %v918_v11 }
  0x38   :  { %941 = vmatpush3.bf16.msra.mxu1 %v940_v36 }
  0x39   :  { %921 = vmatpush3.bf16.msra.mxu0 %v920_v16  ;;  %942 = vmatprep.subr.bf16.mxu1 %v1001_v50  ;;  %v967_v16 = vpack.c.bf16 %v525_v15, %v524_v14 }
  0x3a   :  { %923 = vmatprep.subr.bf16.mxu0 %v922_v17  ;;  %v636_v17 = vld [vmem:[%s1476_s4] ss:$0 sm:$0xff]  ;;  %s1004_s4 = smov [#allocation2]  }
  0x3c   :  { %944 = vmatpush3.bf16.msra.mxu1 %v943_v39 }
  0x3d   :  { %925 = vmatpush3.bf16.msra.mxu0 %v924_v22  ;;  %945 = vmatprep.subr.bf16.mxu1 %v1001_v50  ;;  %v637_v22 = vld [vmem:[%s1478_s6] ss:$0 sm:$0xff] }
  0x3e   :  { %927 = vmatprep.subr.bf16.mxu0 %v926_v23 }
  0x40   :  { %947 = vmatpush3.bf16.msra.mxu1 %v946_v42 }
  0x41   :  { %929 = vmatpush3.bf16.msra.mxu0 %v928_v26  ;;  %948 = vmatprep.subr.bf16.mxu1 %v1001_v50 }
  0x42   :  { %957 = vmatprep.subr.bf16.mxu0 %v1001_v50 }
  0x44   :  { %348 = vmatmul.mubr.f32.vlgmr.msra.gmra.mrb[2].mxu0 %v31_v27  ;;  %950 = vmatpush3.bf16.msra.mxu1 %v949_v45 }
  0x45   :  { %831 = vmatprep.mubr.msk.f32.mxu0 %vm1002_vm0, %v1003_v60  ;;  %951 = vmatprep.subr.bf16.mxu1 %v1001_v50  ;;  %v523_v60 = vld [vmem:[%s1477_s5 + $0x28] sm:$0xff]  ;;  %s626_s5 = sshll.u32 %s1004_s4, 4  ;;  %s627_s5 = int_to_ptr.vmem [resolvable:$true] %s626_s5 }
  0x46   :  { %959 = vmatpush3.bf16.msra.mxu0 %v958_v56  ;;  %v964_v61 = vpack.c.bf16 %v523_v60, %v522_v59  ;;  %s977_s6 = scalar_lea.vmem %s627_s5, 128  ;;  %p982_p1 = scmp.lt.s32.totalorder %s627_s5, %s627_s5 }
  0x47   :  { %960 = vmatprep.subr.bf16.mxu0 %v1001_v50  ;;  %p978_p0 = scmp.ne.s32.totalorder %s627_s5, %s977_s6  ;;  %p983_p2 = scmp.lt.s32.totalorder %s977_s6, %s977_s6 }
  0x48   :  { %953 = vmatpush3.bf16.msra.mxu1 %v952_v48 }
  0x49   :  { %954 = vmatprep.subr.bf16.mxu1 %v1001_v50  ;;  %p984_p3 = por %p983_p2, %p982_p1 }
  0x4a   :  { %962 = vmatpush3.bf16.msra.mxu0 %v961_v58 }
  0x4b   :  { %963 = vmatprep.subr.bf16.mxu0 %v1001_v50  ;;  %p985_p4 = pnand %p984_p3, %p978_p0 }
  0x4c   :  { %956 = vmatpush3.bf16.msra.mxu1 %v955_v52 }
  0x4e   :  { %965 = vmatpush3.bf16.msra.mxu0 %v964_v61 }
  0x4f   :  { %966 = vmatprep.subr.bf16.mxu0 %v1001_v50 }
  0x52   :  { %968 = vmatpush3.bf16.msra.mxu0 %v967_v16 }
  0xf7   :  { %v671_v62 = vpop.f32.mrb[0].mxu0 }
  0xf8   :  { %v672_v0 = vpop.f32.mrb[1].mxu0 }
  0xf9   :  { %v706_v1 = vpop.f32.mrb[0].mxu1  ;;  %v673_v2 = vadd.f32 %v672_v0, %v671_v62 }
  0xfa   :  { %v707_v3 = vpop.f32.mrb[1].mxu1 }
  0xfb   :  { %v708_v4 = vadd.f32 %v707_v3, %v706_v1  ;;  %v210_v5 = vadd.f32 %v673_v2, %v634_v63 }
  0xfd   :  { %v280_v6 = vadd.f32 %v708_v4, %v210_v5  ;;  %v419_v7 = vpop.f32.mrb[2].mxu1 }
  0xfe   :  { %v779_v8 = vpop.f32.mrb[3].mxu1 }
 0x117   :  { %v741_v9 = vpop.f32.mrb[2].mxu0 }
 0x118   :  { %v742_v10 = vpop.f32.mrb[3].mxu0 }
 0x119   :  { %v743_v11 = vadd.f32 %v742_v10, %v741_v9 }
 0x11b   :  { %v350_v12 = vadd.f32 %v743_v11, %v280_v6 }
 0x11d   :  { %v420_v13 = vadd.f32 %v419_v7, %v350_v12 }
 0x11f   :  { %v423_v50 = vmax.f32 %v420_v13, 0.0 }
 0x121   :  { %813 = vmatmul.mubr.f32.vlgmr.msra.gmra.mrb[4].mxu1 %v423_v50 }
 0x1f4   :  { %v513_v18 = vpop.f32.mrb[4].mxu1 }
 0x1f5   :  { %v514_v19 = vadd.f32 %v636_v17, %v513_v18  ;;  %v814_v20 = vpop.f32.mrb[5].mxu1 }
 0x1f7   :  { %v517_v21 = vmax.f32 %v514_v19, 0.0 }
 0x1f9   :  { %832 = vmatmul.mubr.msk.f32.vlgmr.msra.gmra.mrb[4].mxu0 %vm533_vm2, %v517_v21 }
 0x2cc   :  { %v603_v23 = vpop.f32.mrb[4].mxu0 }
 0x2cd   :  { %v604_v24 = vadd.f32 %v637_v22, %v603_v23  ;;  %v833_v25 = vpop.f32.mrb[5].mxu0 }
 0x2cf   :  { %v608_v26 = vsel %vm607_vm3, %v604_v24, -inf }
 0x2d0   :  { %609 = vmax.xlane.f32.xlu0 %v608_v26 }
 0x35d   :  { %v610_v27 = vpop.xlane.xlu0 %609 }
 0x35e   :  { %v611_v28 = vsub.f32 %v604_v24, %v610_v27 }
 0x360   :  { %v612_v29 = vmul.f32 1.442695, %v611_v28 }
 0x362   :  { %973 = vpow2.f32 %v612_v29 }
 0x36c   :  { %v974_v30 = vpop.eup %973 }
 0x36d   :  { %v614_v31 = vsel %vm607_vm3, %v974_v30, 0.0 }
 0x36e   :  { %615 = vadd.xlane.f32.xlu0 %v614_v31 }
 0x3fb   :  { %v616_v32 = vpop.xlane.xlu0 %615 }
 0x3fc   :  { %975 = vrcp.f32 %v616_v32 }
 0x406   :  { %v976_v33 = vpop.eup %975 }
 0x407   :  { %v618_v34 = vmul.f32 %v976_v33, %v974_v30 }
 0x409   :  { %619 = vst.msk [vmem:[#allocation2] sm:$0xff] %vm607_vm3, %v618_v34 }
 0x40a   :  { %988 = shalt.err (!%p985_p4)
}
 0x40b   :  { %s989_s1 = scalar_lea.hbm %s1479_s7, 128 }
 0x40c   :  { %p990_p5 = scmp.ne.s32.totalorder %s1479_s7, %s989_s1  ;;  %p993_p6 = scmp.lt.u32.totalorder %s989_s1, %s1479_s7 }
 0x40e   :  { %p995_p7 = pnand %p993_p6, %p990_p5 }
 0x410   :  { %998 = shalt.err (!%p995_p7)
}
 0x411   :  { %629 = dma.vmem_to_hbm [thread:$0]  %s627_s5, 128, %s1479_s7, [#allocation3]  }
 0x412   :  { %999 = dma.done.wait [#allocation3], 128  }
 0x413   :  { %1000 = vsyncadd [#allocation3], 4294967168 }
 0x414   :  { %633 = vsyncpa [#allocation3], 1 }

</bundles_post_ra>
